<compile_context>
chip_gen: v7x
topology: tpu7x:2x2x1
jax: 0.10.0
libtpu: 0.0.40
codegen_flags: <defaults>
</compile_context>

<pallas_src>
import functools

import jax
import jax.numpy as jnp
from jax import lax
from jax.experimental import pallas as pl
from jax.experimental.pallas import tpu as pltpu


def _round_up(x, m):
    return ((x + m - 1) // m) * m


def rawnet_kernel(x_ref, w1_ref, b1_ref, w2_ref, b2_ref, w3_ref, b3_ref, out_ref,
                  *, chunk, n_chunks, unroll):
    """One batch tile of the RawNet forward, batch on the lane axis.

    x_ref  : [2, TB]   input features (transposed)
    w1_ref : [H, 2]    fc1 weight (PyTorch [out, in])
    b1_ref : [H, 1]
    w2_ref : [H, H]    fc2 weight
    b2_ref : [H, 1]
    w3_ref : [1, H]    out weight as a row (MXU LHS)
    b3_ref : [1, 1]
    out_ref: [1, TB]
    """
    # Hoist parameter loads (and the fc1 weight column slices) out of the chunk
    # loop -- JAX does not CSE broadcasts inside loops.
    w1 = w1_ref[...]                     # [H, 2]
    b1 = b1_ref[...]                     # [H, 1]
    w2 = w2_ref[...]                     # [H, H]
    b2 = b2_ref[...]                     # [H, 1]
    w3 = w3_ref[...]                     # [1, H]
    b3 = b3_ref[...]                     # [1, 1]
    w1a = w1[:, 0:1]
    w1b = w1[:, 1:2]

    def body(c, carry):
        off = pl.multiple_of(c * chunk, chunk)
        x = x_ref[:, pl.ds(off, chunk)]                               # [2, chunk]

        # fc1: K=2 contraction as two broadcast FMAs on the VPU (skips the MXU).
        z1 = w1a * x[0:1, :] + w1b * x[1:2, :] + b1                   # [H, chunk]
        h1 = jnp.tanh(z1)

        # fc2: the real matmul -> MXU, f32 accumulation.
        z2 = jnp.dot(w2, h1, preferred_element_type=jnp.float32) + b2
        h2 = jnp.tanh(z2)                                             # [H, chunk]

        # out: N=1 projection also on the (idle) MXU instead of VPU+XLU.
        logits = jnp.dot(w3, h2, preferred_element_type=jnp.float32) + b3   # [1, chunk]
        out_ref[:, pl.ds(off, chunk)] = jax.nn.sigmoid(logits).astype(out_ref.dtype)
        return carry

    lax.fori_loop(0, n_chunks, body, None, unroll=unroll)


def _choose_tiling(B, H, *, max_tile_b=131072, vmem_budget_bytes=12 << 20):
    """Pick (chunk, tile_b, b_pad, grid_n) for the batch (lane) axis.

    chunk is sized so one [H, chunk] intermediate is ~16 vregs; tile_b is sized
    from the scoped-VMEM budget (double-buffered x/out tiles + resident params),
    which keeps the same formula valid on v5e (16 MiB default scoped), v6e and
    v7x (64 MiB physical per TC).
    """
    chunk = min(512, max(128, ((16384 // max(H, 1)) // 128) * 128))
    b128 = _round_up(B, 128)

    per_lane = 4 * (2 + 1) * 2                     # x(2 rows)+out(1 row), f32, x2 buffers
    param_bytes = 2 * 4 * (2 * H + H + H * H + H + H + 1)
    chunk_scratch = 6 * H * chunk * 4              # per-chunk intermediates (headroom)
    usable = max(vmem_budget_bytes - param_bytes - chunk_scratch, per_lane * chunk)
    cap = max(chunk, (usable // per_lane) // chunk * chunk)
    cap = min(cap, max_tile_b)

    n = pl.cdiv(b128, cap)
    if b128 >= 2 * chunk:
        n = max(n, 2)                              # >= 2 parallel steps feeds both v7x TCs
    tb = _round_up(pl.cdiv(b128, n), chunk)        # balanced tiles: waste < chunk per tile
    b_pad = n * tb
    return chunk, tb, b_pad, n


def rawnet_forward(x, params, *, max_tile_b=131072, vmem_budget_bytes=12 << 20):
    """x: [B, 2] f32.  params in PyTorch layout ([out, in] weights, [out] biases)."""
    w1, b1, w2, b2, w3, b3 = params
    B = x.shape[0]
    H = w1.shape[0]

    chunk, tb, b_pad, n = _choose_tiling(
        B, H, max_tile_b=max_tile_b, vmem_budget_bytes=vmem_budget_bytes)
    n_chunks = tb // chunk
    unroll = n_chunks <= 8

    # Layout plumbing (host side): batch onto the 128-lane axis.
    # TODO(synk): producers that can emit x directly in [2, B] lane-dense layout
    # should do so -- this transpose/pad is an extra HBM pass outside the kernel.
    x_t = jnp.pad(x.astype(jnp.float32).T, ((0, 0), (0, b_pad - B)))   # [2, b_pad]
    w1c = w1.astype(jnp.float32)                                       # [H, 2]
    b1c = b1.reshape(H, 1).astype(jnp.float32)
    w2c = w2.astype(jnp.float32)                                       # [H, H]
    b2c = b2.reshape(H, 1).astype(jnp.float32)
    w3r = w3.reshape(1, H).astype(jnp.float32)                         # [1, H] row (MXU LHS)
    b3c = b3.reshape(1, 1).astype(jnp.float32)

    def const(shape):
        # Parameters: constant block index -> stay VMEM-resident across the grid.
        return pl.BlockSpec(shape, lambda i: (0, 0))

    # Advisory cost for the XLA scheduler, based on the padded batch processed.
    flops = 2 * b_pad * (2 * H + H * H + H)
    transcendentals = b_pad * (2 * H + 1)
    bytes_accessed = 4 * (b_pad * 3 + 2 * H + H * H + 3 * H + 1)

    # Scoped VMEM: double-buffered x/out tiles + params + chunk scratch, with
    # headroom; capped at 32 MiB so the same setting is valid on v5e/v6e/v7x.
    tile_bytes = 2 * 4 * (2 + 1) * tb
    param_bytes = 2 * 4 * (2 * H + H + H * H + H + H + 1)
    vmem_limit = int(min(32 << 20,
                         max(4 << 20,
                             2 * (tile_bytes + param_bytes + 6 * H * chunk * 4))))

    kernel = functools.partial(rawnet_kernel, chunk=chunk, n_chunks=n_chunks, unroll=unroll)

    out_t = pl.pallas_call(
        kernel,
        out_shape=jax.ShapeDtypeStruct((1, b_pad), jnp.float32),
        grid=(n,),
        in_specs=[
            pl.BlockSpec((2, tb), lambda i: (0, i)),   # x tile (streamed / double-buffered)
            const((H, 2)),                             # w1
            const((H, 1)),                             # b1
            const((H, H)),                             # w2
            const((H, 1)),                             # b2
            const((1, H)),                             # w3 row
            const((1, 1)),                             # b3
        ],
        out_specs=pl.BlockSpec((1, tb), lambda i: (0, i)),
        compiler_params=pltpu.CompilerParams(
            dimension_semantics=("parallel",),         # shard batch tiles across TCs (v7x)
            vmem_limit_bytes=vmem_limit,
        ),
        cost_estimate=pl.CostEstimate(
            flops=flops,
            transcendentals=transcendentals,
            bytes_accessed=bytes_accessed,
        ),
    )(x_t, w1c, b1c, w2c, b2c, w3r, b3c)

    return out_t[:, :B].T                              # [B, 1]


def init_rawnet_params(key, num_hid):
    """PyTorch nn.Linear-style init: U(-1/sqrt(fan_in), 1/sqrt(fan_in)); w=[out,in], b=[out]."""
    def linear(k, fan_in, fan_out):
        kw, kb = jax.random.split(k)
        bound = 1.0 / jnp.sqrt(fan_in)
        w = jax.random.uniform(kw, (fan_out, fan_in), jnp.float32, -bound, bound)
        b = jax.random.uniform(kb, (fan_out,), jnp.float32, -bound, bound)
        return w, b

    k1, k2, k3 = jax.random.split(key, 3)
    w1, b1 = linear(k1, 2, num_hid)
    w2, b2 = linear(k2, num_hid, num_hid)
    w3, b3 = linear(k3, num_hid, 1)
    return (w1, b1, w2, b2, w3, b3)


def rawnet_reference(x, params):
    w1, b1, w2, b2, w3, b3 = params
    h1 = jnp.tanh(x @ w1.T + b1)
    h2 = jnp.tanh(h1 @ w2.T + b2)
    return jax.nn.sigmoid(h2 @ w3.T + b3)


if __name__ == "__main__":
    num_hid = 32
    batch = 8

    key = jax.random.PRNGKey(0)
    kx, kp = jax.random.split(key)
    x = jax.random.normal(kx, (batch, 2), dtype=jnp.float32)
    params = init_rawnet_params(kp, num_hid)

    out = rawnet_forward(x, params)
    out = jax.block_until_ready(out)

    ref = rawnet_reference(x, params)
    assert out.shape == (batch, 1)
    assert jnp.allclose(out, ref, atol=1e-5, rtol=1e-5)

    print("KERNEL_OK")
</pallas_src>

<mosaic_0001>
module attributes {stable_mosaic.version = 11 : i64} {
  func.func @rawnet_kernel(%arg0: i32, %arg1: memref<2x512xf32, #tpu.memory_space<vmem>>, %arg2: memref<32x2xf32, #tpu.memory_space<vmem>>, %arg3: memref<32x1xf32, #tpu.memory_space<vmem>>, %arg4: memref<32x32xf32, #tpu.memory_space<vmem>>, %arg5: memref<32x1xf32, #tpu.memory_space<vmem>>, %arg6: memref<1x32xf32, #tpu.memory_space<vmem>>, %arg7: memref<1x1xf32, #tpu.memory_space<vmem>>, %arg8: memref<1x512xf32, #tpu.memory_space<vmem>>) attributes {dimension_semantics = [#tpu.dimension_semantics<parallel>], iteration_bounds = array<i64: 1>, scalar_prefetch = 0 : i64, scratch_operands = 0 : i64, tpu.core_type = #tpu.core_type<tc>, window_params = [{transform_indices = @transform_0, window_bounds = array<i64: 2, 512>}, {pipeline_mode = #tpu.pipeline_mode<synchronous>, transform_indices = @transform_1, window_bounds = array<i64: 32, 2>}, {pipeline_mode = #tpu.pipeline_mode<synchronous>, transform_indices = @transform_2, window_bounds = array<i64: 32, 1>}, {pipeline_mode = #tpu.pipeline_mode<synchronous>, transform_indices = @transform_3, window_bounds = array<i64: 32, 32>}, {pipeline_mode = #tpu.pipeline_mode<synchronous>, transform_indices = @transform_4, window_bounds = array<i64: 32, 1>}, {pipeline_mode = #tpu.pipeline_mode<synchronous>, transform_indices = @transform_5, window_bounds = array<i64: 1, 32>}, {pipeline_mode = #tpu.pipeline_mode<synchronous>, transform_indices = @transform_6, window_bounds = array<i64: 1, 1>}, {transform_indices = @transform_7, window_bounds = array<i64: 1, 512>}]} {
    %c0 = arith.constant 0 : index
    %c0_0 = arith.constant 0 : index
    %0 = vector.load %arg2[%c0, %c0_0] : memref<32x2xf32, #tpu.memory_space<vmem>>, vector<32x2xf32>
    %c0_1 = arith.constant 0 : index
    %c0_2 = arith.constant 0 : index
    %1 = vector.load %arg3[%c0_1, %c0_2] : memref<32x1xf32, #tpu.memory_space<vmem>>, vector<32x1xf32>
    %c0_3 = arith.constant 0 : index
    %c0_4 = arith.constant 0 : index
    %2 = vector.load %arg4[%c0_3, %c0_4] : memref<32x32xf32, #tpu.memory_space<vmem>>, vector<32x32xf32>
    %c0_5 = arith.constant 0 : index
    %c0_6 = arith.constant 0 : index
    %3 = vector.load %arg5[%c0_5, %c0_6] : memref<32x1xf32, #tpu.memory_space<vmem>>, vector<32x1xf32>
    %c0_7 = arith.constant 0 : index
    %c0_8 = arith.constant 0 : index
    %4 = vector.load %arg6[%c0_7, %c0_8] : memref<1x32xf32, #tpu.memory_space<vmem>>, vector<1x32xf32>
    %c0_9 = arith.constant 0 : index
    %c0_10 = arith.constant 0 : index
    %5 = vector.load %arg7[%c0_9, %c0_10] : memref<1x1xf32, #tpu.memory_space<vmem>>, vector<1x1xf32>
    %6 = vector.extract_strided_slice %0 {offsets = [0, 0], sizes = [32, 1], strides = [1, 1]} : vector<32x2xf32> to vector<32x1xf32>
    %7 = vector.extract_strided_slice %0 {offsets = [0, 1], sizes = [32, 1], strides = [1, 1]} : vector<32x2xf32> to vector<32x1xf32>
    %c0_i32 = arith.constant 0 : i32
    %c512_i32 = arith.constant 512 : i32
    %8 = arith.muli %c0_i32, %c512_i32 : i32
    %9 = tpu.assume_multiple %8, 512 : i32
    %c0_11 = arith.constant 0 : index
    %10 = arith.index_cast %9 : i32 to index
    %11 = vector.load %arg1[%c0_11, %10] : memref<2x512xf32, #tpu.memory_space<vmem>>, vector<2x512xf32>
    %12 = vector.extract_strided_slice %11 {offsets = [0, 0], sizes = [1, 512], strides = [1, 1]} : vector<2x512xf32> to vector<1x512xf32>
    %13 = vector.broadcast %6 : vector<32x1xf32> to vector<32x512xf32>
    %14 = vector.broadcast %12 : vector<1x512xf32> to vector<32x512xf32>
    %15 = arith.mulf %13, %14 : vector<32x512xf32>
    %16 = vector.extract_strided_slice %11 {offsets = [1, 0], sizes = [1, 512], strides = [1, 1]} : vector<2x512xf32> to vector<1x512xf32>
    %17 = vector.broadcast %7 : vector<32x1xf32> to vector<32x512xf32>
    %18 = vector.broadcast %16 : vector<1x512xf32> to vector<32x512xf32>
    %19 = arith.mulf %17, %18 : vector<32x512xf32>
    %20 = arith.addf %15, %19 : vector<32x512xf32>
    %21 = vector.broadcast %1 : vector<32x1xf32> to vector<32x512xf32>
    %22 = arith.addf %20, %21 : vector<32x512xf32>
    %23 = math.tanh %22 : vector<32x512xf32>
    %cst = arith.constant dense<0.000000e+00> : vector<32x512xf32>
    %24 = tpu.matmul %2, %23, %cst {dimension_numbers = #tpu.dot_dimension_numbers<[1], [0], [0], [1], [0, 0, 1, 1], [], []>} : vector<32x32xf32>, vector<32x512xf32>, vector<32x512xf32> -> vector<32x512xf32>
    %25 = vector.broadcast %3 : vector<32x1xf32> to vector<32x512xf32>
    %26 = arith.addf %24, %25 : vector<32x512xf32>
    %27 = math.tanh %26 : vector<32x512xf32>
    %cst_12 = arith.constant dense<0.000000e+00> : vector<1x512xf32>
    %28 = tpu.matmul %4, %27, %cst_12 {dimension_numbers = #tpu.dot_dimension_numbers<[1], [0], [0], [1], [0, 0, 1, 1], [], []>} : vector<1x32xf32>, vector<32x512xf32>, vector<1x512xf32> -> vector<1x512xf32>
    %29 = vector.broadcast %5 : vector<1x1xf32> to vector<1x512xf32>
    %30 = arith.addf %28, %29 : vector<1x512xf32>
    %31 = arith.negf %30 : vector<1x512xf32>
    %32 = math.exp %31 : vector<1x512xf32>
    %cst_13 = arith.constant 1.000000e+00 : f32
    %33 = vector.broadcast %cst_13 : f32 to vector<1x512xf32>
    %34 = arith.addf %33, %32 : vector<1x512xf32>
    %35 = arith.divf %33, %34 : vector<1x512xf32>
    %c0_14 = arith.constant 0 : index
    %36 = arith.index_cast %9 : i32 to index
    %37 = vector.load %arg8[%c0_14, %36] : memref<1x512xf32, #tpu.memory_space<vmem>>, vector<1x512xf32>
    tpu.vector_store %arg8[%c0_14, %36], %35 {strides = array<i32>} : memref<1x512xf32, #tpu.memory_space<vmem>>, vector<1x512xf32>,
    %c1_i32 = arith.constant 1 : i32
    return
  }
  func.func @transform_0(%arg0: i32) -> (i32, i32) {
    %c0_i32 = arith.constant 0 : i32
    %c0_i32_0 = arith.constant 0 : i32
    return %c0_i32, %arg0 : i32, i32
  }
  func.func @transform_1(%arg0: i32) -> (i32, i32) {
    %c0_i32 = arith.constant 0 : i32
    %c0_i32_0 = arith.constant 0 : i32
    %c0_i32_1 = arith.constant 0 : i32
    return %c0_i32, %c0_i32_0 : i32, i32
  }
  func.func @transform_2(%arg0: i32) -> (i32, i32) {
    %c0_i32 = arith.constant 0 : i32
    %c0_i32_0 = arith.constant 0 : i32
    %c0_i32_1 = arith.constant 0 : i32
    return %c0_i32, %c0_i32_0 : i32, i32
  }
  func.func @transform_3(%arg0: i32) -> (i32, i32) {
    %c0_i32 = arith.constant 0 : i32
    %c0_i32_0 = arith.constant 0 : i32
    %c0_i32_1 = arith.constant 0 : i32
    return %c0_i32, %c0_i32_0 : i32, i32
  }
  func.func @transform_4(%arg0: i32) -> (i32, i32) {
    %c0_i32 = arith.constant 0 : i32
    %c0_i32_0 = arith.constant 0 : i32
    %c0_i32_1 = arith.constant 0 : i32
    return %c0_i32, %c0_i32_0 : i32, i32
  }
  func.func @transform_5(%arg0: i32) -> (i32, i32) {
    %c0_i32 = arith.constant 0 : i32
    %c0_i32_0 = arith.constant 0 : i32
    %c0_i32_1 = arith.constant 0 : i32
    return %c0_i32, %c0_i32_0 : i32, i32
  }
  func.func @transform_6(%arg0: i32) -> (i32, i32) {
    %c0_i32 = arith.constant 0 : i32
    %c0_i32_0 = arith.constant 0 : i32
    %c0_i32_1 = arith.constant 0 : i32
    return %c0_i32, %c0_i32_0 : i32, i32
  }
  func.func @transform_7(%arg0: i32) -> (i32, i32) {
    %c0_i32 = arith.constant 0 : i32
    %c0_i32_0 = arith.constant 0 : i32
    return %c0_i32, %arg0 : i32, i32
  }
}

</mosaic_0001>

<bundles_post_ra>
// kernel: tpu_custom_call.1
= control target key start
LH: loop header
LB: loop body
LE: loop exit
PB: predicated region body
PF: predicated region fallthrough
CT: control target
= control target key end

     0   :  { %s1056_s0 = inlined_call_operand.vmem [shape: f32[2,512], index: 0, kind: input, shape index: {}]   ;;  %s1057_s1 = inlined_call_operand.vmem [shape: f32[32,2], index: 1, kind: input, shape index: {}]   ;;  %s1058_s2 = inlined_call_operand.vmem [shape: f32[32,1], index: 2, kind: input, shape index: {}]   ;;  %s1059_s3 = inlined_call_operand.vmem [shape: f32[32,32], index: 3, kind: input, shape index: {}]   ;;  %s1060_s4 = inlined_call_operand.vmem [shape: f32[32,1], index: 4, kind: input, shape index: {}]   ;;  %s1061_s5 = inlined_call_operand.vmem [shape: f32[1,32], index: 5, kind: input, shape index: {}]   ;;  %s1062_s6 = inlined_call_operand.<no memory space> [shape: f32[1,1], index: 6, kind: input, shape index: {}]   ;;  %s1063_s7 = inlined_call_operand.hbm [shape: f32[1,512], index: 7, kind: output, shape index: {}]  }
   0x1   :  { %v12_v0 = vstv %s1062_s6 }
   0x2   :  { %13 = vst [vmem:[#allocation2] sm:$0x1] %v12_v0 }
   0x3   :  { %v31_v1 = vld [vmem:[%s1057_s1 + $0x10] sm:$0xff]  ;;  %v29_v2 = vld [vmem:[%s1057_s1] sm:$0xff]  ;;  %v871_v3 = vmov 1   ;;  %v30_v4 = vld [vmem:[%s1057_s1 + $0x8] sm:$0xff] }
   0x4   :  { %763 = vset.pattern.permute.xlu0 %v871_v3  ;;  %761 = vset.pattern.permute.xlu1 %v871_v3 }
   0x5   :  { %130 = vperm.xlu0 %763, %v31_v1   ;;  %122 = vperm.xlu1 %761, %v29_v2  }
   0x6   :  { %14 = vsyncpa [#allocation4], 0  ;;  %v872_v5 = vmov 0   ;;  %v32_v6 = vld [vmem:[%s1057_s1 + $0x18] sm:$0xff]  ;;  %v34_v7 = vld [vmem:[%s1058_s2 + $0x8] sm:$0xff]  ;;  %v873_v16 = vmov 0.0   ;;  %v69_v17 = vlaneseq }
   0x7   :  { %v33_v8 = vld [vmem:[%s1058_s2] sm:$0xff]  ;;  %v35_v10 = vld [vmem:[%s1058_s2 + $0x10] sm:$0xff]  ;;  %v36_v12 = vld [vmem:[%s1058_s2 + $0x18] sm:$0xff]  ;;  %354 = vmatprep.mubr.f32.mxu0 %v873_v16  ;;  %443 = vmatprep.mubr.f32.mxu1 %v873_v16  ;;  %vm277_vm0 = vcmask 261120  }
   0x8   :  { %v41_v9 = vld [vmem:[%s1060_s4] sm:$0xff]  ;;  %v43_v11 = vld [vmem:[%s1060_s4 + $0x10] sm:$0xff]  ;;  %v42_v14 = vld [vmem:[%s1060_s4 + $0x8] sm:$0xff]  ;;  %v958_v18 = vshrl.u32 %v69_v17, 7  ;;  %vm693_vm1 = vcmp.lt.s32.totalorder %v69_v17, 512 }
   0x9   :  { %764 = vset.pattern.permute.xlu0 %v872_v5  ;;  %126 = vperm.xlu1 %761, %v30_v4   ;;  %v46_v13 = vld [vmem:[#allocation2] sm:$0x1]  ;;  %v44_v15 = vld [vmem:[%s1060_s4 + $0x18] sm:$0xff] }
   0xa   :  { %50 = vperm.xlu0 %764, %v29_v2   ;;  %v139_v19 = vsub.s32 1, %v958_v18  ;;  %v143_v20 = vsub.s32 3, %v958_v18  ;;  %v47_v21 = vld [vmem:[%s1056_s0] sm:$0xff]  ;;  %v147_v22 = vsub.s32 5, %v958_v18  ;;  %v151_v25 = vsub.s32 7, %v958_v18 }
   0xb   :  { %v968_v26 = vsub.s32 0, %v958_v18  ;;  %v75_v27 = vsub.s32 2, %v958_v18  ;;  %v79_v28 = vsub.s32 4, %v958_v18  ;;  %v83_v31 = vsub.s32 6, %v958_v18 }
   0xc   :  { %v140_v29 = vrot.slane %v47_v21, %v139_v19  ;;  %v144_v30 = vrot.slane %v47_v21, %v143_v20  ;;  %v148_v32 = vrot.slane %v47_v21, %v147_v22  ;;  %v152_v34 = vrot.slane %v47_v21, %v151_v25 }
   0xd   :  { %762 = vset.pattern.permute.xlu1 %v872_v5  ;;  %v72_v35 = vrot.slane %v47_v21, %v968_v26  ;;  %v76_v36 = vrot.slane %v47_v21, %v75_v27  ;;  %v80_v38 = vrot.slane %v47_v21, %v79_v28  ;;  %v84_v41 = vrot.slane %v47_v21, %v83_v31 }
   0xe   :  { %55 = vperm.xlu0 %764, %v30_v4   ;;  %65 = vperm.xlu1 %762, %v32_v6   ;;  %v160_v39 = vrot.slane %v140_v29, %v139_v19  ;;  %v164_v40 = vrot.slane %v144_v30, %v139_v19  ;;  %v974_v42 = vrot.slane %v148_v32, %v139_v19 }
   0xf   :  { %v976_v43 = vrot.slane %v152_v34, %v139_v19  ;;  %v92_v44 = vrot.slane %v72_v35, %v968_v26  ;;  %v96_v45 = vrot.slane %v76_v36, %v968_v26  ;;  %v983_v48 = vrot.slane %v80_v38, %v968_v26 }
  0x10   :  { %v986_v51 = vrot.slane %v84_v41, %v968_v26 }
  0x12   :  { %60 = vperm.xlu0 %764, %v31_v1   ;;  %765 = vset.pattern.permute.xlu1 %v871_v3 }
  0x13   :  { %134 = vperm.xlu1 %765, %v32_v6  }
  0x16   :  { %212 = vperm.xlu0 %764, %v34_v7  }
  0x17   :  { %766 = vset.pattern.permute.xlu1 %v872_v5 }
  0x18   :  { %207 = vperm.xlu1 %766, %v33_v8  }
  0x1a   :  { %259 = vperm.xlu0 %764, %v41_v9  }
  0x1c   :  { %217 = vperm.xlu1 %766, %v35_v10  }
  0x1e   :  { %269 = vperm.xlu0 %764, %v43_v11  }
  0x20   :  { %222 = vperm.xlu1 %766, %v36_v12  }
  0x22   :  { %486 = vperm.xlu0 %764, %v46_v13  }
  0x24   :  { %264 = vperm.xlu1 %766, %v42_v14  }
  0x28   :  { %274 = vperm.xlu1 %766, %v44_v15  }
  0x84   :  { %v123_v23 = vpop.permute.xlu1 %122  ;;  %v131_v24 = vpop.permute.xlu0 %130 }
  0x85   :  { %v173_v49 = vmul.f32 %v160_v39, %v123_v23  ;;  %v174_v50 = vmul.f32 %v164_v40, %v123_v23  ;;  %v175_v52 = vmul.f32 %v974_v42, %v123_v23  ;;  %v176_v56 = vmul.f32 %v976_v43, %v123_v23 }
  0x86   :  { %v181_v61 = vmul.f32 %v160_v39, %v131_v24  ;;  %v182_v2 = vmul.f32 %v164_v40, %v131_v24  ;;  %v183_v6 = vmul.f32 %v974_v42, %v131_v24  ;;  %v184_v10 = vmul.f32 %v976_v43, %v131_v24 }
  0x88   :  { %v127_v33 = vpop.permute.xlu1 %126 }
  0x89   :  { %v51_v37 = vpop.permute.xlu0 %50  ;;  %v177_v62 = vmul.f32 %v160_v39, %v127_v33  ;;  %v178_v63 = vmul.f32 %v164_v40, %v127_v33  ;;  %v179_v0 = vmul.f32 %v974_v42, %v127_v33  ;;  %v180_v3 = vmul.f32 %v976_v43, %v127_v33 }
  0x8a   :  { %v105_v57 = vmul.f32 %v92_v44, %v51_v37  ;;  %v106_v58 = vmul.f32 %v96_v45, %v51_v37  ;;  %v107_v4 = vmul.f32 %v983_v48, %v51_v37  ;;  %v108_v5 = vmul.f32 %v986_v51, %v51_v37 }
  0x8c   :  { %v189_v13 = vadd.f32 %v173_v49, %v105_v57  ;;  %v190_v14 = vadd.f32 %v174_v50, %v106_v58  ;;  %v191_v25 = vadd.f32 %v175_v52, %v107_v4  ;;  %v192_v27 = vadd.f32 %v176_v56, %v108_v5 }
  0x8d   :  { %v56_v46 = vpop.permute.xlu0 %55  ;;  %v980_v47 = vpop.permute.xlu1 %65 }
  0x8e   :  { %v109_v53 = vmul.f32 %v92_v44, %v56_v46  ;;  %v110_v54 = vmul.f32 %v96_v45, %v56_v46  ;;  %v111_v55 = vmul.f32 %v983_v48, %v56_v46  ;;  %v112_v59 = vmul.f32 %v986_v51, %v56_v46 }
  0x8f   :  { %v117_v29 = vmul.f32 %v92_v44, %v980_v47  ;;  %v118_v24 = vmul.f32 %v96_v45, %v980_v47 }
  0x90   :  { %v193_v7 = vadd.f32 %v177_v62, %v109_v53  ;;  %v194_v8 = vadd.f32 %v178_v63, %v110_v54  ;;  %v195_v9 = vadd.f32 %v179_v0, %v111_v55  ;;  %v196_v12 = vadd.f32 %v180_v3, %v112_v59 }
  0x91   :  { %v61_v60 = vpop.permute.xlu0 %60  ;;  %v120_v55 = vmul.f32 %v986_v51, %v980_v47 }
  0x92   :  { %v135_v1 = vpop.permute.xlu1 %134  ;;  %v113_v15 = vmul.f32 %v92_v44, %v61_v60  ;;  %v114_v22 = vmul.f32 %v96_v45, %v61_v60  ;;  %v115_v30 = vmul.f32 %v983_v48, %v61_v60  ;;  %v116_v32 = vmul.f32 %v986_v51, %v61_v60 }
  0x93   :  { %v185_v34 = vmul.f32 %v160_v39, %v135_v1  ;;  %v186_v37 = vmul.f32 %v164_v40, %v135_v1  ;;  %v187_v44 = vmul.f32 %v974_v42, %v135_v1  ;;  %v188_v45 = vmul.f32 %v976_v43, %v135_v1 }
  0x94   :  { %v197_v36 = vadd.f32 %v181_v61, %v113_v15  ;;  %v198_v41 = vadd.f32 %v182_v2, %v114_v22  ;;  %v199_v49 = vadd.f32 %v183_v6, %v115_v30  ;;  %v200_v52 = vadd.f32 %v184_v10, %v116_v32 }
  0x95   :  { %v213_v11 = vpop.permute.xlu0 %212  ;;  %v119_v39 = vmul.f32 %v983_v48, %v980_v47  ;;  %v201_v40 = vadd.f32 %v185_v34, %v117_v29  ;;  %v202_v42 = vadd.f32 %v186_v37, %v118_v24  ;;  %v204_v43 = vadd.f32 %v188_v45, %v120_v55 }
  0x96   :  { %v229_v19 = vadd.f32 %v213_v11, %v193_v7  ;;  %v230_v20 = vadd.f32 %v213_v11, %v194_v8  ;;  %v231_v21 = vadd.f32 %v213_v11, %v195_v9  ;;  %v232_v23 = vadd.f32 %v213_v11, %v196_v12 }
  0x97   :  { %v208_v28 = vpop.permute.xlu1 %207  ;;  %v203_v58 = vadd.f32 %v187_v44, %v119_v39 }
  0x98   :  { %767 = vtanh.f32 %v229_v19  ;;  %v225_v31 = vadd.f32 %v208_v28, %v189_v13  ;;  %v226_v33 = vadd.f32 %v208_v28, %v190_v14  ;;  %v227_v35 = vadd.f32 %v208_v28, %v191_v25  ;;  %v38_v25 = vld [vmem:[%s1059_s3 + $0x8] sm:$0xff] }
  0x99   :  { %769 = vtanh.f32 %v230_v20  ;;  %v228_v38 = vadd.f32 %v208_v28, %v192_v27  ;;  %v39_v27 = vld [vmem:[%s1059_s3 + $0x10] sm:$0xff]  ;;  %v40_v28 = vld [vmem:[%s1059_s3 + $0x18] sm:$0xff]  ;;  %v260_v29 = vpop.permute.xlu0 %259 }
  0x9a   :  { %771 = vtanh.f32 %v231_v21 }
  0x9b   :  { %773 = vtanh.f32 %v232_v23  ;;  %v218_v46 = vpop.permute.xlu1 %217  ;;  %v37_v23 = vld [vmem:[%s1059_s3] sm:$0xff] }
  0x9c   :  { %775 = vtanh.f32 %v225_v31  ;;  %v233_v50 = vadd.f32 %v218_v46, %v197_v36  ;;  %v234_v53 = vadd.f32 %v218_v46, %v198_v41  ;;  %v235_v54 = vadd.f32 %v218_v46, %v199_v49 }
  0x9d   :  { %777 = vtanh.f32 %v226_v33  ;;  %v236_v56 = vadd.f32 %v218_v46, %v200_v52  ;;  %v270_v45 = vpop.permute.xlu0 %269 }
  0x9e   :  { %779 = vtanh.f32 %v227_v35 }
  0x9f   :  { %781 = vtanh.f32 %v228_v38  ;;  %v223_v57 = vpop.permute.xlu1 %222 }
  0xa0   :  { %783 = vtanh.f32 %v233_v50  ;;  %v237_v59 = vadd.f32 %v223_v57, %v201_v40  ;;  %v238_v60 = vadd.f32 %v223_v57, %v202_v42  ;;  %v239_v62 = vadd.f32 %v223_v57, %v203_v58 }
  0xa1   :  { %785 = vtanh.f32 %v234_v53  ;;  %v240_v63 = vadd.f32 %v223_v57, %v204_v43 }
  0xa2   :  { %v768_v61 = vpop.eup %767  ;;  %787 = vtanh.f32 %v235_v54 }
  0xa3   :  { %v770_v48 = vpop.eup %769  ;;  %789 = vtanh.f32 %v236_v56  ;;  %v265_v36 = vpop.permute.xlu1 %264 }
  0xa4   :  { %v772_v0 = vpop.eup %771  ;;  %791 = vtanh.f32 %v237_v59 }
  0xa5   :  { %v774_v1 = vpop.eup %773  ;;  %793 = vtanh.f32 %v238_v60 }
  0xa6   :  { %v776_v47 = vpop.eup %775  ;;  %795 = vtanh.f32 %v239_v62 }
  0xa7   :  { %v778_v51 = vpop.eup %777  ;;  %797 = vtanh.f32 %v240_v63  ;;  %v726_v2 = vpack.c.bf16 %v768_v61, %v776_v47  ;;  %v275_v57 = vpop.permute.xlu1 %274 }
  0xa8   :  { %v780_v3 = vpop.eup %779  ;;  %v724_v4 = vpack.c.bf16 %v770_v48, %v778_v51 }
  0xa9   :  { %v782_v5 = vpop.eup %781  ;;  %v734_v6 = vpack.c.bf16 %v772_v0, %v780_v3 }
  0xaa   :  { %v784_v7 = vpop.eup %783  ;;  %725 = vmatprep.subr.bf16.mxu0 %v724_v4  ;;  %v732_v8 = vpack.c.bf16 %v774_v1, %v782_v5 }
  0xab   :  { %v786_v9 = vpop.eup %785  ;;  %727 = vmatpush1.bf16.msra.mxu0 %v726_v2 }
  0xac   :  { %v788_v10 = vpop.eup %787  ;;  %733 = vmatprep.subr.bf16.mxu1 %v732_v8 }
  0xad   :  { %v790_v11 = vpop.eup %789  ;;  %735 = vmatpush1.bf16.msra.mxu1 %v734_v6 }
  0xae   :  { %v792_v12 = vpop.eup %791 }
  0xaf   :  { %v794_v13 = vpop.eup %793  ;;  %v730_v14 = vpack.c.bf16 %v792_v12, %v784_v7 }
  0xb0   :  { %v796_v15 = vpop.eup %795  ;;  %v728_v19 = vpack.c.bf16 %v794_v13, %v786_v9 }
  0xb1   :  { %v798_v20 = vpop.eup %797  ;;  %v738_v21 = vpack.c.bf16 %v796_v15, %v788_v10 }
  0xb2   :  { %729 = vmatprep.subr.bf16.mxu0 %v728_v19  ;;  %v736_v22 = vpack.c.bf16 %v798_v20, %v790_v11 }
  0xb3   :  { %731 = vmatpush1.bf16.msra.mxu0 %v730_v14 }
  0xb4   :  { %737 = vmatprep.subr.bf16.mxu1 %v736_v22 }
  0xb5   :  { %739 = vmatpush1.bf16.msra.mxu1 %v738_v21 }
  0xb6   :  { %710 = vmatmul.mubr.msk.f32.vlgmr.msra.gmra.mrb[0].mxu0 %vm277_vm0, %v37_v23 }
  0xb7   :  { %360 = vmatprep.mubr.f32.mxu0 %v873_v16 }
  0xb8   :  { %714 = vmatmul.mubr.msk.f32.vlgmr.msra.gmra.mrb[0].mxu1 %vm277_vm0, %v37_v23 }
  0xb9   :  { %449 = vmatprep.mubr.f32.mxu1 %v873_v16 }
  0xba   :  { %711 = vmatmul.mubr.msk.f32.gmra.mrb[2].mxu0 %vm277_vm0, %v38_v25 }
  0xbb   :  { %366 = vmatprep.mubr.f32.mxu0 %v873_v16 }
  0xbc   :  { %715 = vmatmul.mubr.msk.f32.gmra.mrb[2].mxu1 %vm277_vm0, %v38_v25 }
  0xbd   :  { %455 = vmatprep.mubr.f32.mxu1 %v873_v16 }
  0xbe   :  { %712 = vmatmul.mubr.msk.f32.gmra.mrb[4].mxu0 %vm277_vm0, %v39_v27 }
  0xbf   :  { %372 = vmatprep.mubr.f32.mxu0 %v873_v16 }
  0xc0   :  { %716 = vmatmul.mubr.msk.f32.gmra.mrb[4].mxu1 %vm277_vm0, %v39_v27 }
  0xc1   :  { %461 = vmatprep.mubr.f32.mxu1 %v873_v16 }
  0xc2   :  { %713 = vmatmul.mubr.msk.f32.gmra.mrb[6].mxu0 %vm277_vm0, %v40_v28 }
  0xc3   :  { %560 = vmatprep.mubr.f32.mxu0 %v873_v16 }
  0xc4   :  { %717 = vmatmul.mubr.msk.f32.gmra.mrb[6].mxu1 %vm277_vm0, %v40_v28  ;;  %v45_v28 = vld [vmem:[%s1061_s5] sm:$0x1]  ;;  %s875_s5 = smov [#allocation3]  }
  0xc5   :  { %631 = vmatprep.mubr.f32.mxu1 %v873_v16  ;;  %s702_s9 = sshll.u32 %s875_s5, 4  ;;  %s703_s9 = int_to_ptr.vmem [resolvable:$true] %s702_s9 }
  0xc6   :  { %s847_s10 = scalar_lea.vmem %s703_s9, 64  ;;  %p852_p1 = scmp.lt.s32.totalorder %s703_s9, %s703_s9 }
  0xc7   :  { %p848_p0 = scmp.ne.s32.totalorder %s703_s9, %s847_s10  ;;  %p853_p2 = scmp.lt.s32.totalorder %s847_s10, %s847_s10 }
  0xc9   :  { %p854_p3 = por %p853_p2, %p852_p1 }
  0xcb   :  { %p855_p4 = pnand %p854_p3, %p848_p0 }
 0x189   :  { %v356_v30 = vpop.f32.mrb[0].mxu0 }
 0x18a   :  { %v357_v31 = vadd.f32 %v356_v30, %v260_v29  ;;  %v358_v24 = vpop.f32.mrb[1].mxu0 }
 0x18b   :  { %v445_v32 = vpop.f32.mrb[0].mxu1  ;;  %v359_v33 = vadd.f32 %v358_v24, %v260_v29 }
 0x18c   :  { %799 = vtanh.f32 %v357_v31  ;;  %v446_v34 = vadd.f32 %v445_v32, %v260_v29  ;;  %v447_v35 = vpop.f32.mrb[1].mxu1 }
 0x18d   :  { %801 = vtanh.f32 %v359_v33  ;;  %v448_v37 = vadd.f32 %v447_v35, %v260_v29  ;;  %v362_v38 = vpop.f32.mrb[2].mxu0  ;;  %v487_v29 = vpop.permute.xlu0 %486 }
 0x18e   :  { %803 = vtanh.f32 %v446_v34  ;;  %v363_v41 = vadd.f32 %v362_v38, %v265_v36  ;;  %v364_v46 = vpop.f32.mrb[3].mxu0  ;;  %v492_v30 = vrot.slane %v487_v29, %v968_v26 }
 0x18f   :  { %805 = vtanh.f32 %v448_v37  ;;  %v451_v44 = vpop.f32.mrb[2].mxu1  ;;  %v365_v49 = vadd.f32 %v364_v46, %v265_v36 }
 0x190   :  { %807 = vtanh.f32 %v363_v41  ;;  %v452_v16 = vadd.f32 %v451_v44, %v265_v36  ;;  %v453_v50 = vpop.f32.mrb[3].mxu1 }
 0x191   :  { %809 = vtanh.f32 %v365_v49  ;;  %v454_v52 = vadd.f32 %v453_v50, %v265_v36  ;;  %v368_v53 = vpop.f32.mrb[4].mxu0 }
 0x192   :  { %811 = vtanh.f32 %v452_v16  ;;  %v369_v39 = vadd.f32 %v368_v53, %v270_v45  ;;  %v370_v54 = vpop.f32.mrb[5].mxu0 }
 0x193   :  { %813 = vtanh.f32 %v454_v52  ;;  %v457_v40 = vpop.f32.mrb[4].mxu1  ;;  %v371_v55 = vadd.f32 %v370_v54, %v270_v45  ;;  %v874_v54 = vmov 1966171168  }
 0x194   :  { %815 = vtanh.f32 %v369_v39  ;;  %v458_v56 = vadd.f32 %v457_v40, %v270_v45  ;;  %v459_v42 = vpop.f32.mrb[5].mxu1  ;;  %v669_v40 = vunpack.c.l.s4 %v874_v54 }
 0x195   :  { %817 = vtanh.f32 %v371_v55  ;;  %v460_v58 = vadd.f32 %v459_v42, %v270_v45  ;;  %v374_v59 = vpop.f32.mrb[6].mxu0 }
 0x196   :  { %v800_v43 = vpop.eup %799  ;;  %819 = vtanh.f32 %v458_v56  ;;  %v375_v60 = vadd.f32 %v374_v59, %v275_v57  ;;  %v376_v61 = vpop.f32.mrb[7].mxu0  ;;  %v670_v55 = vunpack.c.0.s8 %v669_v40 }
 0x197   :  { %v802_v62 = vpop.eup %801  ;;  %821 = vtanh.f32 %v460_v58  ;;  %v463_v48 = vpop.f32.mrb[6].mxu1  ;;  %v377_v63 = vadd.f32 %v376_v61, %v275_v57 }
 0x198   :  { %v804_v0 = vpop.eup %803  ;;  %823 = vtanh.f32 %v375_v60  ;;  %v464_v1 = vadd.f32 %v463_v48, %v275_v57  ;;  %v465_v47 = vpop.f32.mrb[7].mxu1  ;;  %v673_v42 = vsub.s32 %v670_v55, %v958_v18 }
 0x199   :  { %v806_v51 = vpop.eup %805  ;;  %825 = vtanh.f32 %v377_v63  ;;  %v466_v2 = vadd.f32 %v465_v47, %v275_v57 }
 0x19a   :  { %v808_v3 = vpop.eup %807  ;;  %827 = vtanh.f32 %v464_v1 }
 0x19b   :  { %v810_v4 = vpop.eup %809  ;;  %829 = vtanh.f32 %v466_v2  ;;  %v742_v5 = vpack.c.bf16 %v808_v3, %v800_v43 }
 0x19c   :  { %v812_v6 = vpop.eup %811  ;;  %v740_v7 = vpack.c.bf16 %v810_v4, %v802_v62 }
 0x19d   :  { %v814_v8 = vpop.eup %813  ;;  %v750_v9 = vpack.c.bf16 %v812_v6, %v804_v0 }
 0x19e   :  { %v816_v10 = vpop.eup %815  ;;  %741 = vmatprep.subr.bf16.mxu0 %v740_v7  ;;  %v748_v11 = vpack.c.bf16 %v814_v8, %v806_v51 }
 0x19f   :  { %v818_v12 = vpop.eup %817  ;;  %743 = vmatpush1.bf16.msra.mxu0 %v742_v5 }
 0x1a0   :  { %v820_v13 = vpop.eup %819  ;;  %749 = vmatprep.subr.bf16.mxu1 %v748_v11 }
 0x1a1   :  { %v822_v14 = vpop.eup %821  ;;  %751 = vmatpush1.bf16.msra.mxu1 %v750_v9 }
 0x1a2   :  { %v824_v15 = vpop.eup %823 }
 0x1a3   :  { %v826_v19 = vpop.eup %825  ;;  %v746_v20 = vpack.c.bf16 %v824_v15, %v816_v10 }
 0x1a4   :  { %v828_v21 = vpop.eup %827  ;;  %v744_v22 = vpack.c.bf16 %v826_v19, %v818_v12 }
 0x1a5   :  { %v830_v23 = vpop.eup %829  ;;  %v754_v25 = vpack.c.bf16 %v828_v21, %v820_v13 }
 0x1a6   :  { %745 = vmatprep.subr.bf16.mxu0 %v744_v22  ;;  %v752_v27 = vpack.c.bf16 %v830_v23, %v822_v14 }
 0x1a7   :  { %747 = vmatpush1.bf16.msra.mxu0 %v746_v20 }
 0x1a8   :  { %753 = vmatprep.subr.bf16.mxu1 %v752_v27 }
 0x1a9   :  { %755 = vmatpush1.bf16.msra.mxu1 %v754_v25 }
 0x1aa   :  { %718 = vmatmul.mubr.msk.f32.vlgmr.msra.gmra.mrb[8].mxu0 %vm277_vm0, %v45_v28 }
 0x1ac   :  { %719 = vmatmul.mubr.msk.f32.vlgmr.msra.gmra.mrb[8].mxu1 %vm277_vm0, %v45_v28 }
 0x27d   :  { %v562_v31 = vpop.f32.mrb[8].mxu0 }
 0x27e   :  { %v563_v24 = vadd.f32 %v562_v31, %v492_v30  ;;  %v564_v32 = vpop.f32.mrb[9].mxu0 }
 0x27f   :  { %v633_v33 = vpop.f32.mrb[8].mxu1  ;;  %v565_v34 = vadd.f32 %v564_v32, %v492_v30 }
 0x280   :  { %v720_v35 = vmul.f32 -1.442695, %v563_v24  ;;  %v634_v36 = vadd.f32 %v633_v33, %v492_v30  ;;  %v635_v37 = vpop.f32.mrb[9].mxu1 }
 0x281   :  { %v721_v38 = vmul.f32 -1.442695, %v565_v34  ;;  %v636_v41 = vadd.f32 %v635_v37, %v492_v30 }
 0x282   :  { %831 = vpow2.f32 %v720_v35  ;;  %v722_v46 = vmul.f32 -1.442695, %v634_v36 }
 0x283   :  { %833 = vpow2.f32 %v721_v38  ;;  %v723_v44 = vmul.f32 -1.442695, %v636_v41 }
 0x284   :  { %835 = vpow2.f32 %v722_v46 }
 0x285   :  { %837 = vpow2.f32 %v723_v44 }
 0x28c   :  { %v832_v49 = vpop.eup %831 }
 0x28d   :  { %v834_v16 = vpop.eup %833  ;;  %v650_v50 = vadd.f32 1.0, %v832_v49 }
 0x28e   :  { %v836_v26 = vpop.eup %835  ;;  %v651_v45 = vadd.f32 1.0, %v834_v16 }
 0x28f   :  { %v838_v52 = vpop.eup %837  ;;  %839 = vrcp.f32 %v650_v50  ;;  %v652_v53 = vadd.f32 1.0, %v836_v26 }
 0x290   :  { %841 = vrcp.f32 %v651_v45  ;;  %v653_v39 = vadd.f32 1.0, %v838_v52 }
 0x291   :  { %843 = vrcp.f32 %v652_v53 }
 0x292   :  { %845 = vrcp.f32 %v653_v39 }
 0x299   :  { %v840_v56 = vpop.eup %839 }
 0x29a   :  { %v842_v57 = vpop.eup %841 }
 0x29b   :  { %v844_v58 = vpop.eup %843  ;;  %v666_v59 = vcombine.low %v840_v56, %v842_v57 }
 0x29c   :  { %v846_v43 = vpop.eup %845 }
 0x29d   :  { %v667_v60 = vcombine.low %v844_v58, %v846_v43  ;;  %v674_v61 = vrot.slane %v666_v59, %v673_v42 }
 0x29f   :  { %v681_v62 = vrot.slane %v667_v60, %v673_v42 }
 0x2a1   :  { %v682_v48 = vcombine.low %v674_v61, %v681_v62 }
 0x2a3   :  { %v689_v63 = vrot.slane %v682_v48, %v673_v42 }
 0x2a5   :  { %695 = vst.msk [vmem:[#allocation3] sm:$0xf] %vm693_vm1, %v689_v63 }
 0x2a6   :  { %858 = shalt.err (!%p855_p4)
}
 0x2a7   :  { %s859_s13 = scalar_lea.hbm %s1063_s7, 64 }
 0x2a8   :  { %p860_p5 = scmp.ne.s32.totalorder %s1063_s7, %s859_s13  ;;  %p863_p6 = scmp.lt.u32.totalorder %s859_s13, %s1063_s7 }
 0x2aa   :  { %p865_p7 = pnand %p863_p6, %p860_p5 }
 0x2ac   :  { %868 = shalt.err (!%p865_p7)
}
 0x2ad   :  { %705 = dma.vmem_to_hbm [thread:$0]  %s703_s9, 64, %s1063_s7, [#allocation4]  }
 0x2ae   :  { %869 = dma.done.wait [#allocation4], 64  }
 0x2af   :  { %870 = vsyncadd [#allocation4], 4294967232 }
 0x2b0   :  { %709 = vsyncpa [#allocation4], 1 }

</bundles_post_ra>
